<compile_context>
chip_gen: v7x
topology: tpu7x:2x2x1
jax: 0.10.0
libtpu: 0.0.40
codegen_flags: <defaults>
</compile_context>

<pallas_src>
import jax
import jax.numpy as jnp
from jax.experimental import pallas as pl
from jax.experimental.pallas import tpu as pltpu


def _round_up(x, m):
    return ((x + m - 1) // m) * m


def _pad_to(x, shape):
    pads = [(0, t - s) for s, t in zip(x.shape, shape)]
    return jnp.pad(x, pads) if any(p for _, p in pads) else x


def singlehop_kernel(kb_ref,       # VMEM [TB, Np, Dcp]
                     q_ref,        # VMEM [TB, De]
                     objnum_ref,   # VMEM [TB, 1] int32
                     wq_ref,       # VMEM [De, Dcp]
                     bq_ref,       # VMEM [1, Dcp]
                     wa_ref,       # VMEM [1, Dcp]
                     ba_ref,       # VMEM [1, 1]
                     out_ref):     # VMEM [TB, Dcp]
    kb = kb_ref[...]                                             # [TB, Np, Dcp]

    # proj_q = Linear(ENC_DIM, CTX_DIM)(vecQuestions) — MXU-shaped matmul per tile.
    proj_q = jnp.dot(q_ref[...], wq_ref[...],
                     preferred_element_type=jnp.float32) + bq_ref[...]   # [TB, Dcp]

    # interactions = F.normalize(kb * proj_q[:, None, :], dim=-1)
    inter = kb * proj_q[:, None, :]                              # [TB, Np, Dcp]
    sq = jnp.sum(inter * inter, axis=-1, keepdims=True)          # [TB, Np, 1]
    # rsqrt on the EUP; max(sq, 1e-24) == clamp_min(norm, 1e-12) since sqrt is monotone.
    inter = inter * jax.lax.rsqrt(jnp.maximum(sq, jnp.float32(1e-24)))

    # raw_att = inter2att(interactions).squeeze(-1)  -> [TB, Np]
    raw = jnp.sum(inter * wa_ref[0], axis=-1) + ba_ref[0, 0]

    # apply_mask1d: positions >= imagesObjectNum -> -1e30 (one vectorized compare+where)
    idx = jax.lax.broadcasted_iota(jnp.int32, raw.shape, 1)      # [TB, Np]
    raw = jnp.where(idx >= objnum_ref[...], jnp.float32(-1e30), raw)

    # softmax over objects
    m = jnp.max(raw, axis=-1, keepdims=True)
    e = jnp.exp(raw - m)
    s = jnp.sum(e, axis=-1, keepdims=True)
    inv = pl.reciprocal(s, approx=True)                          # EUP rcp
    inv = inv * (2.0 - s * inv)                                  # one Newton step -> ~f32 exact
    att = e * inv                                                # [TB, Np]

    # x_att = bmm(att[:, None, :], kb).squeeze(1)  -> [TB, Dcp]
    if kb.shape[1] >= 128:
        # Large object counts: push the contraction through the MXU.
        out = jax.lax.dot_general(
            att, kb, dimension_numbers=(((1,), (1,)), ((0,), (0,))),
            preferred_element_type=jnp.float32)
    else:
        # Tiny N: broadcast-multiply + sublane reduce beats an M=1 bmm.
        out = jnp.sum(att[:, :, None] * kb, axis=1)
    out_ref[...] = out


def single_hop(kb, vec_questions, images_object_num, wq, bq, wa, ba,
               *, tile_b=None, vmem_budget_bytes=8 * 1024 * 1024):
    B, N, D_ctx = kb.shape
    D_enc = vec_questions.shape[1]

    # Zero-padding is exact:
    #  * padded channels: zeros do not change the L2 norm, the inter2att dot, or the
    #    readout (padded output channels are sliced away).
    #  * padded objects: idx >= imagesObjectNum masks them to -1e30 before softmax.
    #  * padded batch rows: computed on zeros (no NaNs) and sliced away.
    D_ctx_p = _round_up(D_ctx, 128)   # lane-dense channels
    N_p = _round_up(N, 8)             # sublane-dense object axis

    if tile_b is None:
        # ~4 live [N_p, D_ctx_p] f32 slabs per batch row (double-buffered kb + intermediates).
        per_row = 4 * N_p * D_ctx_p * 4
        tile_b = (vmem_budget_bytes // max(per_row, 1)) // 8 * 8
        tile_b = max(8, min(128, tile_b))          # 8 MiB budget -> safe on v7x's 64 MiB VMEM
    tile_b = min(tile_b, _round_up(B, 8))          # don't pad the batch further than needed
    B_p = _round_up(B, tile_b)

    kb_p = _pad_to(kb.astype(jnp.float32), (B_p, N_p, D_ctx_p))
    q_p = _pad_to(vec_questions.astype(jnp.float32), (B_p, D_enc))
    obj_p = _pad_to(images_object_num.astype(jnp.int32).reshape(B, 1), (B_p, 1))
    wq_p = _pad_to(wq.astype(jnp.float32), (D_enc, D_ctx_p))
    bq_p = _pad_to(bq.astype(jnp.float32), (1, D_ctx_p))
    wa_p = _pad_to(wa.astype(jnp.float32), (1, D_ctx_p))
    ba_p = ba.astype(jnp.float32).reshape(1, 1)

    out = pl.pallas_call(
        singlehop_kernel,
        out_shape=jax.ShapeDtypeStruct((B_p, D_ctx_p), jnp.float32),
        grid=(B_p // tile_b,),
        in_specs=[
            pl.BlockSpec((tile_b, N_p, D_ctx_p), lambda i: (i, 0, 0)),   # kb
            pl.BlockSpec((tile_b, D_enc),        lambda i: (i, 0)),      # vecQuestions
            pl.BlockSpec((tile_b, 1),            lambda i: (i, 0)),      # imagesObjectNum
            pl.BlockSpec((D_enc, D_ctx_p),       lambda i: (0, 0)),      # Wq (grid-resident)
            pl.BlockSpec((1, D_ctx_p),           lambda i: (0, 0)),      # bq
            pl.BlockSpec((1, D_ctx_p),           lambda i: (0, 0)),      # Wa
            pl.BlockSpec((1, 1),                 lambda i: (0, 0)),      # ba
        ],
        out_specs=pl.BlockSpec((tile_b, D_ctx_p), lambda i: (i, 0)),
        compiler_params=pltpu.CompilerParams(
            dimension_semantics=("parallel",)),
    )(kb_p, q_p, obj_p, wq_p, bq_p, wa_p, ba_p)

    return out[:B, :D_ctx]


def single_hop_ref(kb, vec_questions, images_object_num, wq, bq, wa, ba):
    """Pure-JAX reference mirroring the PyTorch forward."""
    proj_q = vec_questions @ wq + bq                               # [B, D_ctx]
    inter = kb * proj_q[:, None, :]                                # [B, N, D_ctx]
    norm = jnp.maximum(jnp.linalg.norm(inter, axis=-1, keepdims=True), 1e-12)
    inter = inter / norm
    raw = jnp.sum(inter * wa[None, :, :], axis=-1) + ba[0, 0]      # [B, N]
    idx = jnp.arange(kb.shape[1])[None, :]
    raw = jnp.where(idx >= images_object_num[:, None], -1e30, raw)
    att = jax.nn.softmax(raw, axis=-1)                             # [B, N]
    return jnp.einsum("bn,bnd->bd", att, kb)                       # [B, D_ctx]


if __name__ == "__main__":
    # Match XLA's reference-path matmul precision to the (f32-accurate) in-kernel dot.
    jax.config.update("jax_default_matmul_precision", "highest")

    B, N = 2, 8
    ENC_DIM, CTX_DIM = 32, 32

    key = jax.random.PRNGKey(0)
    k_kb, k_q, k_wq, k_bq, k_wa, k_ba = jax.random.split(key, 6)

    kb = jax.random.normal(k_kb, (B, N, CTX_DIM), dtype=jnp.float32)
    vec_questions = jax.random.normal(k_q, (B, ENC_DIM), dtype=jnp.float32)
    images_object_num = jnp.array([N, 5], dtype=jnp.int32)

    # Deterministic "synthetic checkpoint" for the two Linear layers.
    wq = jax.random.normal(k_wq, (ENC_DIM, CTX_DIM), dtype=jnp.float32) * 0.1
    bq = jax.random.normal(k_bq, (1, CTX_DIM), dtype=jnp.float32) * 0.1
    wa = jax.random.normal(k_wa, (1, CTX_DIM), dtype=jnp.float32) * 0.1
    ba = jax.random.normal(k_ba, (1, 1), dtype=jnp.float32) * 0.1

    out = single_hop(kb, vec_questions, images_object_num, wq, bq, wa, ba)
    out = jax.block_until_ready(out)

    ref = single_hop_ref(kb, vec_questions, images_object_num, wq, bq, wa, ba)
    assert out.shape == (B, CTX_DIM)
    assert jnp.allclose(out, ref, atol=1e-4, rtol=1e-4), "mismatch vs reference"

    print("KERNEL_OK")
</pallas_src>

<mosaic_0001>
module attributes {stable_mosaic.version = 11 : i64} {
  func.func @singlehop_kernel(%arg0: i32, %arg1: memref<8x8x128xf32, #tpu.memory_space<vmem>>, %arg2: memref<8x32xf32, #tpu.memory_space<vmem>>, %arg3: memref<8x1xi32, #tpu.memory_space<vmem>>, %arg4: memref<32x128xf32, #tpu.memory_space<vmem>>, %arg5: memref<1x128xf32, #tpu.memory_space<vmem>>, %arg6: memref<1x128xf32, #tpu.memory_space<vmem>>, %arg7: memref<1x1xf32, #tpu.memory_space<vmem>>, %arg8: memref<8x128xf32, #tpu.memory_space<vmem>>) attributes {dimension_semantics = [#tpu.dimension_semantics<parallel>], iteration_bounds = array<i64: 1>, scalar_prefetch = 0 : i64, scratch_operands = 0 : i64, tpu.core_type = #tpu.core_type<tc>, window_params = [{transform_indices = @transform_0, window_bounds = array<i64: 8, 8, 128>}, {transform_indices = @transform_1, window_bounds = array<i64: 8, 32>}, {transform_indices = @transform_2, window_bounds = array<i64: 8, 1>}, {pipeline_mode = #tpu.pipeline_mode<synchronous>, transform_indices = @transform_3, window_bounds = array<i64: 32, 128>}, {pipeline_mode = #tpu.pipeline_mode<synchronous>, transform_indices = @transform_4, window_bounds = array<i64: 1, 128>}, {pipeline_mode = #tpu.pipeline_mode<synchronous>, transform_indices = @transform_5, window_bounds = array<i64: 1, 128>}, {pipeline_mode = #tpu.pipeline_mode<synchronous>, transform_indices = @transform_6, window_bounds = array<i64: 1, 1>}, {transform_indices = @transform_7, window_bounds = array<i64: 8, 128>}]} {
    %c0 = arith.constant 0 : index
    %c0_0 = arith.constant 0 : index
    %c0_1 = arith.constant 0 : index
    %0 = vector.load %arg1[%c0, %c0_0, %c0_1] : memref<8x8x128xf32, #tpu.memory_space<vmem>>, vector<8x8x128xf32>
    %c0_2 = arith.constant 0 : index
    %c0_3 = arith.constant 0 : index
    %1 = vector.load %arg2[%c0_2, %c0_3] : memref<8x32xf32, #tpu.memory_space<vmem>>, vector<8x32xf32>
    %c0_4 = arith.constant 0 : index
    %c0_5 = arith.constant 0 : index
    %2 = vector.load %arg4[%c0_4, %c0_5] : memref<32x128xf32, #tpu.memory_space<vmem>>, vector<32x128xf32>
    %cst = arith.constant dense<0.000000e+00> : vector<8x128xf32>
    %3 = tpu.matmul %1, %2, %cst {dimension_numbers = #tpu.dot_dimension_numbers<[1], [0], [0], [1], [0, 0, 1, 1], [], []>, precision = #tpu.contract_precision<fp32>} : vector<8x32xf32>, vector<32x128xf32>, vector<8x128xf32> -> vector<8x128xf32>
    %c0_6 = arith.constant 0 : index
    %c0_7 = arith.constant 0 : index
    %4 = vector.load %arg5[%c0_6, %c0_7] : memref<1x128xf32, #tpu.memory_space<vmem>>, vector<1x128xf32>
    %5 = vector.broadcast %4 : vector<1x128xf32> to vector<8x128xf32>
    %6 = arith.addf %3, %5 : vector<8x128xf32>
    %7 = vector.shape_cast %6 : vector<8x128xf32> to vector<8x1x128xf32>
    %8 = vector.broadcast %7 : vector<8x1x128xf32> to vector<8x8x128xf32>
    %9 = arith.mulf %0, %8 : vector<8x8x128xf32>
    %10 = arith.mulf %9, %9 : vector<8x8x128xf32>
    %cst_8 = arith.constant dense<0.000000e+00> : vector<8x8xf32>
    %11 = vector.multi_reduction <add>, %10, %cst_8 [2] : vector<8x8x128xf32> to vector<8x8xf32>
    %12 = vector.shape_cast %11 : vector<8x8xf32> to vector<8x8x1xf32>
    %cst_9 = arith.constant 1.000000e-24 : f32
    %13 = vector.broadcast %cst_9 : f32 to vector<8x8x1xf32>
    %14 = arith.maximumf %12, %13 : vector<8x8x1xf32>
    %15 = math.rsqrt %14 : vector<8x8x1xf32>
    %16 = vector.broadcast %15 : vector<8x8x1xf32> to vector<8x8x128xf32>
    %17 = arith.mulf %9, %16 : vector<8x8x128xf32>
    %c0_10 = arith.constant 0 : index
    %c0_11 = arith.constant 0 : index
    %18 = vector.load %arg6[%c0_10, %c0_11] : memref<1x128xf32, #tpu.memory_space<vmem>>, vector<1x128xf32>
    %19 = vector.shape_cast %18 : vector<1x128xf32> to vector<128xf32>
    %20 = vector.shape_cast %19 : vector<128xf32> to vector<1x1x128xf32>
    %21 = vector.broadcast %20 : vector<1x1x128xf32> to vector<8x8x128xf32>
    %22 = arith.mulf %17, %21 : vector<8x8x128xf32>
    %cst_12 = arith.constant dense<0.000000e+00> : vector<8x8xf32>
    %23 = vector.multi_reduction <add>, %22, %cst_12 [2] : vector<8x8x128xf32> to vector<8x8xf32>
    %c0_13 = arith.constant 0 : index
    %c0_14 = arith.constant 0 : index
    %24 = vector.load %arg7[%c0_13, %c0_14] : memref<1x1xf32, #tpu.memory_space<vmem>>, vector<1x1xf32>
    %25 = vector.extract %24[0, 0] : f32 from vector<1x1xf32>
    %26 = vector.broadcast %25 : f32 to vector<8x8xf32>
    %27 = arith.addf %23, %26 : vector<8x8xf32>
    %28 = tpu.iota {dimensions = array<i32: 1>} : vector<8x8xi32>
    %c0_15 = arith.constant 0 : index
    %c0_16 = arith.constant 0 : index
    %29 = vector.load %arg3[%c0_15, %c0_16] : memref<8x1xi32, #tpu.memory_space<vmem>>, vector<8x1xi32>
    %30 = vector.broadcast %29 : vector<8x1xi32> to vector<8x8xi32>
    %31 = arith.cmpi sge, %28, %30 : vector<8x8xi32>
    %cst_17 = arith.constant -1.000000e+30 : f32
    %32 = vector.broadcast %cst_17 : f32 to vector<8x8xf32>
    %33 = arith.select %31, %32, %27 : vector<8x8xi1>, vector<8x8xf32>
    %cst_18 = arith.constant dense<0xFF800000> : vector<8xf32>
    %34 = vector.multi_reduction <maximumf>, %33, %cst_18 [1] : vector<8x8xf32> to vector<8xf32>
    %35 = vector.shape_cast %34 : vector<8xf32> to vector<8x1xf32>
    %36 = vector.broadcast %35 : vector<8x1xf32> to vector<8x8xf32>
    %37 = arith.subf %33, %36 : vector<8x8xf32>
    %38 = math.exp %37 : vector<8x8xf32>
    %cst_19 = arith.constant dense<0.000000e+00> : vector<8xf32>
    %39 = vector.multi_reduction <add>, %38, %cst_19 [1] : vector<8x8xf32> to vector<8xf32>
    %40 = vector.shape_cast %39 : vector<8xf32> to vector<8x1xf32>
    %41 = tpu.reciprocal %40 {approx = true} : vector<8x1xf32> -> vector<8x1xf32>
    %42 = arith.mulf %40, %41 : vector<8x1xf32>
    %cst_20 = arith.constant 2.000000e+00 : f32
    %43 = vector.broadcast %cst_20 : f32 to vector<8x1xf32>
    %44 = arith.subf %43, %42 : vector<8x1xf32>
    %45 = arith.mulf %41, %44 : vector<8x1xf32>
    %46 = vector.broadcast %45 : vector<8x1xf32> to vector<8x8xf32>
    %47 = arith.mulf %38, %46 : vector<8x8xf32>
    %48 = vector.shape_cast %47 : vector<8x8xf32> to vector<8x8x1xf32>
    %49 = vector.broadcast %48 : vector<8x8x1xf32> to vector<8x8x128xf32>
    %50 = arith.mulf %49, %0 : vector<8x8x128xf32>
    %cst_21 = arith.constant dense<0.000000e+00> : vector<8x128xf32>
    %51 = vector.multi_reduction <add>, %50, %cst_21 [1] : vector<8x8x128xf32> to vector<8x128xf32>
    %c0_22 = arith.constant 0 : index
    %c0_23 = arith.constant 0 : index
    %52 = vector.load %arg8[%c0_22, %c0_23] : memref<8x128xf32, #tpu.memory_space<vmem>>, vector<8x128xf32>
    tpu.vector_store %arg8[%c0_22, %c0_23], %51 {strides = array<i32>} : memref<8x128xf32, #tpu.memory_space<vmem>>, vector<8x128xf32>,
    return
  }
  func.func @transform_0(%arg0: i32) -> (i32, i32, i32) {
    %c0_i32 = arith.constant 0 : i32
    %c0_i32_0 = arith.constant 0 : i32
    %c0_i32_1 = arith.constant 0 : i32
    return %arg0, %c0_i32, %c0_i32_0 : i32, i32, i32
  }
  func.func @transform_1(%arg0: i32) -> (i32, i32) {
    %c0_i32 = arith.constant 0 : i32
    %c0_i32_0 = arith.constant 0 : i32
    return %arg0, %c0_i32 : i32, i32
  }
  func.func @transform_2(%arg0: i32) -> (i32, i32) {
    %c0_i32 = arith.constant 0 : i32
    %c0_i32_0 = arith.constant 0 : i32
    return %arg0, %c0_i32 : i32, i32
  }
  func.func @transform_3(%arg0: i32) -> (i32, i32) {
    %c0_i32 = arith.constant 0 : i32
    %c0_i32_0 = arith.constant 0 : i32
    %c0_i32_1 = arith.constant 0 : i32
    return %c0_i32, %c0_i32_0 : i32, i32
  }
  func.func @transform_4(%arg0: i32) -> (i32, i32) {
    %c0_i32 = arith.constant 0 : i32
    %c0_i32_0 = arith.constant 0 : i32
    %c0_i32_1 = arith.constant 0 : i32
    return %c0_i32, %c0_i32_0 : i32, i32
  }
  func.func @transform_5(%arg0: i32) -> (i32, i32) {
    %c0_i32 = arith.constant 0 : i32
    %c0_i32_0 = arith.constant 0 : i32
    %c0_i32_1 = arith.constant 0 : i32
    return %c0_i32, %c0_i32_0 : i32, i32
  }
  func.func @transform_6(%arg0: i32) -> (i32, i32) {
    %c0_i32 = arith.constant 0 : i32
    %c0_i32_0 = arith.constant 0 : i32
    %c0_i32_1 = arith.constant 0 : i32
    return %c0_i32, %c0_i32_0 : i32, i32
  }
  func.func @transform_7(%arg0: i32) -> (i32, i32) {
    %c0_i32 = arith.constant 0 : i32
    %c0_i32_0 = arith.constant 0 : i32
    return %arg0, %c0_i32 : i32, i32
  }
}

</mosaic_0001>

<bundles_post_ra>
// kernel: tpu_custom_call.1
= control target key start
LH: loop header
LB: loop body
LE: loop exit
PB: predicated region body
PF: predicated region fallthrough
CT: control target
= control target key end

     0   :  { %s1452_s0 = inlined_call_operand.hbm [shape: f32[8,8,128], index: 0, kind: input, shape index: {}]   ;;  %s1453_s1 = inlined_call_operand.vmem [shape: f32[8,32], index: 1, kind: input, shape index: {}]   ;;  %s1454_s2 = inlined_call_operand.vmem [shape: s32[8,1], index: 2, kind: input, shape index: {}]   ;;  %s1455_s3 = inlined_call_operand.hbm [shape: f32[32,128], index: 3, kind: input, shape index: {}]   ;;  %s1456_s4 = inlined_call_operand.vmem [shape: f32[1,128], index: 4, kind: input, shape index: {}]   ;;  %s1457_s5 = inlined_call_operand.vmem [shape: f32[1,128], index: 5, kind: input, shape index: {}]   ;;  %s1458_s6 = inlined_call_operand.<no memory space> [shape: f32[1,1], index: 6, kind: input, shape index: {}]   ;;  %s1459_s7 = inlined_call_operand.hbm [shape: f32[8,128], index: 7, kind: output, shape index: {}]  }
   0x1   :  { %v12_v0 = vstv %s1458_s6 }
   0x2   :  { %13 = vst [vmem:[#allocation2] sm:$0x1] %v12_v0 }
   0x3   :  { %14 = vsyncpa [#allocation4], 0 }
   0x4   :  { %15 = vsyncpa [#allocation7], 0 }
   0x5   :  { %16 = vsyncpa [#allocation5], 0  ;;  %s1226_s26 = smov [#allocation3]   ;;  %s1154_s30 = scalar_lea.hbm %s1452_s0, 1024 }
   0x6   :  { %s22_s27 = sshll.u32 %s1226_s26, 4  ;;  %p1155_p0 = scmp.ne.s32.totalorder %s1452_s0, %s1154_s30  ;;  %s23_s27 = int_to_ptr.vmem [resolvable:$true] %s22_s27 }
   0x7   :  { %p1158_p1 = scmp.lt.u32.totalorder %s1154_s30, %s1452_s0 }
   0x9   :  { %p1160_p2 = pnand %p1158_p1, %p1155_p0 }
   0xb   :  { %1163 = shalt.err (!%p1160_p2)
}
   0xc   :  { %s1164_s6 = scalar_lea.vmem %s23_s27, 1024  ;;  %p1169_p4 = scmp.lt.s32.totalorder %s23_s27, %s23_s27 }
   0xd   :  { %p1165_p3 = scmp.ne.s32.totalorder %s23_s27, %s1164_s6  ;;  %p1170_p5 = scmp.lt.s32.totalorder %s1164_s6, %s1164_s6 }
   0xf   :  { %p1171_p6 = por %p1170_p5, %p1169_p4 }
  0x11   :  { %p1172_p7 = pnand %p1171_p6, %p1165_p3 }
  0x13   :  { %1175 = shalt.err (!%p1172_p7)
}
  0x14   :  { %s1227_s12 = smov 128   ;;  %s1228_s13 = smov 8  }
  0x15   :  { %28 = dma.hbm_to_vmem [thread:$0]  %s1452_s0, 1024, %s23_s27, [#allocation4], %s1227_s12, %s1227_s12, %s1228_s13  }
  0x16   :  { %s1229_s16 = smov [#allocation6]   ;;  %s1176_s20 = scalar_lea.hbm %s1455_s3, 512 }
  0x17   :  { %s38_s17 = sshll.u32 %s1229_s16, 4  ;;  %p1177_p8 = scmp.ne.s32.totalorder %s1455_s3, %s1176_s20  ;;  %s39_s17 = int_to_ptr.vmem [resolvable:$true] %s38_s17 }
  0x18   :  { %p1180_p9 = scmp.lt.u32.totalorder %s1176_s20, %s1455_s3 }
  0x1a   :  { %p1182_p10 = pnand %p1180_p9, %p1177_p8 }
  0x1c   :  { %1185 = shalt.err (!%p1182_p10)
}
  0x1d   :  { %s1186_s25 = scalar_lea.vmem %s39_s17, 512  ;;  %p1191_p12 = scmp.lt.s32.totalorder %s39_s17, %s39_s17 }
  0x1e   :  { %p1187_p11 = scmp.ne.s32.totalorder %s39_s17, %s1186_s25  ;;  %p1192_p13 = scmp.lt.s32.totalorder %s1186_s25, %s1186_s25 }
  0x20   :  { %p1193_p0 = por %p1192_p13, %p1191_p12 }
  0x22   :  { %p1194_p1 = pnand %p1193_p0, %p1187_p11 }
  0x24   :  { %1197 = shalt.err (!%p1194_p1)
}
  0x25   :  { %44 = dma.hbm_to_vmem [thread:$0]  %s1455_s3, 512, %s39_s17, [#allocation7], %s1227_s12, %s1227_s12, %s1228_s13  }
  0x26   :  { %1220 = dma.done.wait [#allocation4], 1024  }
  0x27   :  { %1221 = vsyncadd [#allocation4], 4294966272 }
  0x28   :  { %1222 = dma.done.wait [#allocation7], 512  }
  0x29   :  { %1223 = vsyncadd [#allocation7], 4294966784  ;;  %v1230_v1 = vmov 0.0|0.0   ;;  %vm1231_vm0 = vmmov 0   ;;  %v1232_v2 = vmov 0.0   ;;  %vm77_vm1 = vcmask 261120  }
  0x2a   :  { %1075 = vmatprep.subr.bf16.mxu1 %v1230_v1  ;;  %1093 = vmatprep.subr.bf16.mxu0 %v1230_v1  ;;  %v66_v3 = vld [vmem:[#allocation6] sm:$0xff]  ;;  %v67_v4 = vld [vmem:[#allocation6 + $0x8] sm:$0xff]  ;;  %v68_v5 = vld [vmem:[#allocation6 + $0x10] sm:$0xff]  ;;  %v1233_v42 = vmov 1966171168   ;;  %v571_v44 = vlaneseq  ;;  %vm801_vm2 = vcmask 1041409  }
  0x2b   :  { %1017 = vmatprep.mubr.msk.f32.mxu1 %vm1231_vm0, %v1232_v2  ;;  %1050 = vmatprep.mubr.msk.f32.mxu0 %vm1231_vm0, %v1232_v2  ;;  %v82_v6 = vand.u32 4294901760, %v66_v3  ;;  %v85_v7 = vand.u32 4294901760, %v67_v4  ;;  %v69_v8 = vld [vmem:[#allocation6 + $0x18] sm:$0xff]  ;;  %v88_v9 = vand.u32 4294901760, %v68_v5  ;;  %v569_v43 = vunpack.c.l.s4 %v1233_v42  ;;  %v1340_v61 = vld [vmem:[#allocation3] sm:$0xff] }
  0x2c   :  { %v65_v10 = vld [vmem:[%s1453_s1] sm:$0xff]  ;;  %v91_v11 = vand.u32 4294901760, %v69_v8  ;;  %v1331_v46 = vshrl.u32 %v571_v44, 7  ;;  %vm803_vm3 = vcmask 1042434   ;;  %vm805_vm4 = vcmask 1043459  }
  0x2d   :  { %v79_v12 = vsel %vm77_vm1, %v65_v10, 0  ;;  %v1076_v13 = vpack.c.bf16 %v85_v7, %v82_v6  ;;  %v162_v14 = vsub.f32 %v66_v3, %v82_v6  ;;  %v169_v15 = vsub.f32 %v67_v4, %v85_v7  ;;  %v977_v47 = vld [vmem:[%s1456_s4] ss:$0 sm:$0xff]  ;;  %v1343_v3 = vld [vmem:[#allocation3 + $0x8] sm:$0xff] }
  0x2e   :  { %v176_v16 = vsub.f32 %v68_v5, %v88_v9  ;;  %v183_v17 = vsub.f32 %v69_v8, %v91_v11  ;;  %v150_v18 = vand.u32 4294901760, %v79_v12  ;;  %v1079_v19 = vpack.c.bf16 %v91_v11, %v88_v9  ;;  %v1348_v5 = vld [vmem:[#allocation3 + $0x10] sm:$0xff] }
  0x2f   :  { %1077 = vmatpush3.bf16.msra.mxu1 %v1076_v13  ;;  %1095 = vmatpush3.bf16.msra.mxu0 %v1076_v13  ;;  %v163_v20 = vand.u32 4294901760, %v162_v14  ;;  %v170_v21 = vand.u32 4294901760, %v169_v15  ;;  %v1088_v40 = vpack.c.bf16 %v169_v15, %v162_v14  ;;  %v570_v45 = vunpack.c.0.s8 %v569_v43 }
  0x30   :  { %v177_v22 = vand.u32 4294901760, %v176_v16  ;;  %1078 = vmatprep.subr.bf16.mxu1 %v1230_v1  ;;  %1096 = vmatprep.subr.bf16.mxu0 %v1230_v1  ;;  %v151_v23 = vsub.f32 %v79_v12, %v150_v18  ;;  %v184_v24 = vand.u32 4294901760, %v183_v17  ;;  %v1091_v41 = vpack.c.bf16 %v183_v17, %v176_v16 }
  0x31   :  { %v164_v25 = vsub.f32 %v162_v14, %v163_v20  ;;  %v171_v26 = vsub.f32 %v169_v15, %v170_v21  ;;  %v1100_v32 = vpack.c.bf16 %v170_v21, %v163_v20  ;;  %v573_v52 = vsub.s32 %v570_v45, %v1331_v46 }
  0x32   :  { %v178_v27 = vsub.f32 %v176_v16, %v177_v22  ;;  %v152_v28 = vand.u32 4294901760, %v151_v23  ;;  %v185_v29 = vsub.f32 %v183_v17, %v184_v24  ;;  %v1103_v38 = vpack.c.bf16 %v184_v24, %v177_v22  ;;  %v1362_v17 = vld [vmem:[#allocation3 + $0x20] sm:$0xff]  ;;  %v1373_v24 = vld [vmem:[#allocation3 + $0x28] sm:$0xff] }
  0x33   :  { %1080 = vmatpush3.bf16.msra.mxu1 %v1079_v19  ;;  %1098 = vmatpush3.bf16.msra.mxu0 %v1079_v19  ;;  %v165_v30 = vand.u32 4294901760, %v164_v25  ;;  %v172_v31 = vand.u32 4294901760, %v171_v26  ;;  %v1338_v57 = vsub.s32 0, %v1331_v46  ;;  %v1376_v26 = vld [vmem:[#allocation3 + $0x30] sm:$0xff]  ;;  %vm807_vm5 = vcmask 1044484  }
  0x34   :  { %v153_v33 = vsub.f32 %v151_v23, %v152_v28  ;;  %1081 = vmatprep.subr.bf16.mxu1 %v1230_v1  ;;  %1099 = vmatprep.subr.bf16.mxu0 %v1230_v1  ;;  %v179_v35 = vand.u32 4294901760, %v178_v27  ;;  %v186_v36 = vand.u32 4294901760, %v185_v29  ;;  %vm809_vm6 = vcmask 1045509  }
  0x35   :  { %v1082_v34 = vpack.c.bf16 %v172_v31, %v165_v30  ;;  %vm811_vm7 = vcmask 1046534   ;;  %vm813_vm8 = vcmask 1047559   ;;  %vm817_vm9 = vcmask 64512  }
  0x36   :  { %v154_v37 = vand.u32 4294901760, %v153_v33  ;;  %1051 = vmatmul.mubr.f32.vlgmr.msra.gmra.mrb[0].mxu0 %v152_v28  ;;  %v1085_v39 = vpack.c.bf16 %v186_v36, %v179_v35 }
  0x37   :  { %1101 = vmatpush3.bf16.msra.mxu0 %v1100_v32  ;;  %1061 = vmatprep.mubr.msk.f32.mxu0 %vm1231_vm0, %v1232_v2  ;;  %v1389_v32 = vld [vmem:[#allocation3 + $0x38] sm:$0xff] }
  0x38   :  { %1018 = vmatmul.mubr.f32.vlgmr.msra.gmra.mrb[0].mxu1 %v154_v37  ;;  %1102 = vmatprep.subr.bf16.mxu0 %v1230_v1  ;;  %v1234_v37 = vmov 0  }
  0x39   :  { %1083 = vmatpush3.bf16.msra.mxu1 %v1082_v34  ;;  %1028 = vmatprep.mubr.msk.f32.mxu1 %vm1231_vm0, %v1232_v2 }
  0x3a   :  { %1084 = vmatprep.subr.bf16.mxu1 %v1230_v1  ;;  %1133 = vset.pattern.permute.xlu0 %v1234_v37 }
  0x3b   :  { %1104 = vmatpush3.bf16.msra.mxu0 %v1103_v38  ;;  %v743_v38 = vld [vmem:[#allocation2] sm:$0x1] }
  0x3c   :  { %1105 = vmatprep.subr.bf16.mxu0 %v1230_v1  ;;  %1121 = vpush %v743_v38 }
  0x3d   :  { %1086 = vmatpush3.bf16.msra.mxu1 %v1085_v39 }
  0x3e   :  { %1087 = vmatprep.subr.bf16.mxu1 %v1230_v1  ;;  %1062 = vmatmul.mubr.f32.vlgmr.msra.gmra.mrb[0].mxu0 %v150_v18 }
  0x3f   :  { %1107 = vmatpush3.bf16.msra.mxu0 %v1076_v13  ;;  %1072 = vmatprep.mubr.msk.f32.mxu0 %vm1231_vm0, %v1232_v2  ;;  %v1358_v13 = vld [vmem:[#allocation3 + $0x18] sm:$0xff] }
  0x40   :  { %1029 = vmatmul.mubr.f32.vlgmr.msra.gmra.mrb[0].mxu1 %v150_v18  ;;  %1108 = vmatprep.subr.bf16.mxu0 %v1230_v1 }
  0x41   :  { %1089 = vmatpush3.bf16.msra.mxu1 %v1088_v40  ;;  %1039 = vmatprep.mubr.msk.f32.mxu1 %vm1231_vm0, %v1232_v2 }
  0x42   :  { %1090 = vmatprep.subr.bf16.mxu1 %v1230_v1 }
  0x43   :  { %1110 = vmatpush3.bf16.msra.mxu0 %v1079_v19 }
  0x45   :  { %1092 = vmatpush3.bf16.msra.mxu1 %v1091_v41 }
  0x46   :  { %1073 = vmatmul.mubr.f32.vlgmr.msra.gmra.mrb[0].mxu0 %v150_v18 }
  0x48   :  { %1040 = vmatmul.mubr.f32.vlgmr.msra.gmra.mrb[0].mxu1 %v151_v23 }
  0x6d   :  { %s1122_s8 = spop %1121 }
 0x119   :  { %v562_v48 = vpop.f32.mrb[0].mxu0 }
 0x11a   :  { %v1074_v49 = vpop.f32.mrb[1].mxu0 }
 0x11b   :  { %v327_v50 = vpop.f32.mrb[0].mxu1 }
 0x11c   :  { %v1111_v51 = vadd.f32 %v977_v47, %v327_v50  ;;  %v1041_v53 = vpop.f32.mrb[1].mxu1 }
 0x11e   :  { %v1112_v54 = vadd.f32 %v1111_v51, %v562_v48 }
 0x120   :  { %v567_v55 = vcombine.high %v1112_v54, %v1112_v54  ;;  %v574_v56 = vrot.slane %v1112_v54, %v573_v52 }
 0x122   :  { %v581_v58 = vrot.slane %v567_v55, %v573_v52  ;;  %v582_v59 = vcombine.high %v574_v56, %v574_v56  ;;  %v590_v60 = vrot.slane %v574_v56, %v573_v52  ;;  %v978_v56 = vld [vmem:[%s1457_s5] ss:$0 sm:$0xff] }
 0x124   :  { %v583_v62 = vcombine.high %v581_v58, %v581_v58  ;;  %v597_v63 = vrot.slane %v581_v58, %v573_v52  ;;  %v604_v0 = vrot.slane %v582_v59, %v573_v52  ;;  %v619_v1 = vrot.slane %v590_v60, %v1338_v57 }
 0x125   :  { %v612_v2 = vcombine.high %v590_v60, %v590_v60 }
 0x126   :  { %v1346_v4 = vmul.f32 %v619_v1, %v1340_v61  ;;  %v623_v6 = vrot.slane %v604_v0, %v1338_v57  ;;  %v614_v7 = vcombine.high %v604_v0, %v604_v0  ;;  %v635_v9 = vrot.slane %v597_v63, %v1338_v57 }
 0x127   :  { %v627_v8 = vrot.slane %v612_v2, %v1338_v57  ;;  %v611_v10 = vrot.slane %v583_v62, %v573_v52  ;;  %v613_v15 = vcombine.high %v597_v63, %v597_v63 }
 0x128   :  { %v664_v11 = vmul.f32 %v1346_v4, %v1346_v4  ;;  %v1356_v12 = vmul.f32 %v623_v6, %v1343_v3  ;;  %v631_v14 = vrot.slane %v614_v7, %v1338_v57  ;;  %v1371_v23 = vmul.f32 %v635_v9, %v1362_v17 }
 0x129   :  { %v658_v16 = vmul.f32 %v627_v8, %v1348_v5  ;;  %v639_v20 = vrot.slane %v611_v10, %v1338_v57  ;;  %v615_v21 = vcombine.high %v611_v10, %v611_v10  ;;  %v643_v25 = vrot.slane %v613_v15, %v1338_v57 }
 0x12a   :  { %672 = vadd.xlane.f32.xlu0 %v664_v11  ;;  %v1365_v19 = vmul.f32 %v631_v14, %v1358_v13  ;;  %v665_v22 = vmul.f32 %v1356_v12, %v1356_v12  ;;  %v668_v30 = vmul.f32 %v1371_v23, %v1371_v23 }
 0x12b   :  { %v666_v18 = vmul.f32 %v658_v16, %v658_v16  ;;  %v1381_v28 = vmul.f32 %v639_v20, %v1373_v24  ;;  %v647_v29 = vrot.slane %v615_v21, %v1338_v57  ;;  %v1387_v31 = vmul.f32 %v643_v25, %v1376_v26 }
 0x12c   :  { %v667_v27 = vmul.f32 %v1365_v19, %v1365_v19 }
 0x12d   :  { %676 = vadd.xlane.f32.xlu1 %v666_v18  ;;  %v669_v33 = vmul.f32 %v1381_v28, %v1381_v28  ;;  %v663_v34 = vmul.f32 %v647_v29, %v1389_v32  ;;  %v670_v35 = vmul.f32 %v1387_v31, %v1387_v31 }
 0x12e   :  { %674 = vadd.xlane.f32.xlu0 %v665_v22 }
 0x12f   :  { %v671_v36 = vmul.f32 %v663_v34, %v663_v34 }
 0x131   :  { %678 = vadd.xlane.f32.xlu1 %v667_v27  ;;  %v755_v27 = vand.u32 127, %v571_v44 }
 0x132   :  { %680 = vadd.xlane.f32.xlu0 %v668_v30 }
 0x133   :  { %v771_v30 = vsub.s32 %v755_v27, %v1331_v46 }
 0x135   :  { %682 = vadd.xlane.f32.xlu1 %v669_v33 }
 0x136   :  { %684 = vadd.xlane.f32.xlu0 %v670_v35 }
 0x139   :  { %686 = vadd.xlane.f32.xlu1 %v671_v36 }
 0x1b7   :  { %v673_v39 = vpop.xlane.xlu0 %672 }
 0x1b8   :  { %v688_v40 = vmax.f32 %v673_v39, 1e-24 }
 0x1ba   :  { %1134 = vrsqrt.f32 %v688_v40  ;;  %v677_v41 = vpop.xlane.xlu1 %676 }
 0x1bb   :  { %v690_v42 = vmax.f32 %v677_v41, 1e-24  ;;  %v675_v43 = vpop.xlane.xlu0 %674 }
 0x1bc   :  { %v689_v45 = vmax.f32 %v675_v43, 1e-24 }
 0x1bd   :  { %1136 = vrsqrt.f32 %v690_v42 }
 0x1be   :  { %1138 = vrsqrt.f32 %v689_v45  ;;  %v679_v47 = vpop.xlane.xlu1 %678 }
 0x1bf   :  { %v691_v48 = vmax.f32 %v679_v47, 1e-24  ;;  %v681_v49 = vpop.xlane.xlu0 %680 }
 0x1c0   :  { %v692_v50 = vmax.f32 %v681_v49, 1e-24 }
 0x1c1   :  { %1140 = vrsqrt.f32 %v691_v48 }
 0x1c2   :  { %1142 = vrsqrt.f32 %v692_v50  ;;  %v683_v51 = vpop.xlane.xlu1 %682 }
 0x1c3   :  { %v693_v52 = vmax.f32 %v683_v51, 1e-24  ;;  %v685_v53 = vpop.xlane.xlu0 %684 }
 0x1c4   :  { %v1135_v54 = vpop.eup %1134  ;;  %v694_v55 = vmax.f32 %v685_v53, 1e-24 }
 0x1c5   :  { %1144 = vrsqrt.f32 %v693_v52  ;;  %v704_v58 = vmul.f32 %v1135_v54, %v1346_v4 }
 0x1c6   :  { %1146 = vrsqrt.f32 %v694_v55  ;;  %v687_v59 = vpop.xlane.xlu1 %686 }
 0x1c7   :  { %v1137_v60 = vpop.eup %1136  ;;  %v695_v62 = vmax.f32 %v687_v59, 1e-24  ;;  %v719_v63 = vmul.f32 %v978_v56, %v704_v58 }
 0x1c8   :  { %v1139_v0 = vpop.eup %1138  ;;  %v706_v1 = vmul.f32 %v1137_v60, %v658_v16 }
 0x1c9   :  { %1148 = vrsqrt.f32 %v695_v62  ;;  %727 = vadd.xlane.f32.xlu0 %v719_v63  ;;  %v705_v2 = vmul.f32 %v1139_v0, %v1356_v12 }
 0x1ca   :  { %v721_v7 = vmul.f32 %v978_v56, %v706_v1 }
 0x1cb   :  { %v1141_v6 = vpop.eup %1140  ;;  %v720_v8 = vmul.f32 %v978_v56, %v705_v2 }
 0x1cc   :  { %v1143_v9 = vpop.eup %1142  ;;  %v707_v10 = vmul.f32 %v1141_v6, %v1365_v19 }
 0x1cd   :  { %731 = vadd.xlane.f32.xlu0 %v721_v7  ;;  %729 = vadd.xlane.f32.xlu1 %v720_v8  ;;  %v708_v4 = vmul.f32 %v1143_v9, %v1371_v23  ;;  %v756_v23 = vld [vmem:[%s1454_s2] sm:$0xff]  ;;  %s1235_s2 = smov [#allocation8]  }
 0x1ce   :  { %v722_v14 = vmul.f32 %v978_v56, %v707_v10  ;;  %s967_s9 = sshll.u32 %s1235_s2, 4  ;;  %s968_s9 = int_to_ptr.vmem [resolvable:$true] %s967_s9 }
 0x1cf   :  { %v1145_v11 = vpop.eup %1144  ;;  %v723_v15 = vmul.f32 %v978_v56, %v708_v4  ;;  %s1198_s10 = scalar_lea.vmem %s968_s9, 128  ;;  %p1203_p3 = scmp.lt.s32.totalorder %s968_s9, %s968_s9 }
 0x1d0   :  { %v1147_v18 = vpop.eup %1146  ;;  %v709_v16 = vmul.f32 %v1145_v11, %v1381_v28  ;;  %v745_v28 = vstv %s1122_s8  ;;  %p1199_p2 = scmp.ne.s32.totalorder %s968_s9, %s1198_s10  ;;  %p1204_p4 = scmp.lt.s32.totalorder %s1198_s10, %s1198_s10 }
 0x1d1   :  { %733 = vadd.xlane.f32.xlu1 %v722_v14  ;;  %735 = vadd.xlane.f32.xlu0 %v723_v15  ;;  %v710_v12 = vmul.f32 %v1147_v18, %v1387_v31 }
 0x1d2   :  { %v724_v21 = vmul.f32 %v978_v56, %v709_v16  ;;  %p1205_p5 = por %p1204_p4, %p1203_p3 }
 0x1d3   :  { %v1149_v20 = vpop.eup %1148  ;;  %v725_v22 = vmul.f32 %v978_v56, %v710_v12  ;;  %v876_v12 = vsub.s32 6, %v1331_v46 }
 0x1d4   :  { %v711_v25 = vmul.f32 %v1149_v20, %v663_v34  ;;  %p1206_p6 = pnand %p1205_p5, %p1199_p2 }
 0x1d5   :  { %737 = vadd.xlane.f32.xlu1 %v724_v21  ;;  %739 = vadd.xlane.f32.xlu0 %v725_v22 }
 0x1d6   :  { %v726_v19 = vmul.f32 %v978_v56, %v711_v25  ;;  %v841_v25 = vsub.s32 1, %v1331_v46 }
 0x1d9   :  { %741 = vadd.xlane.f32.xlu1 %v726_v19 }
 0x1eb   :  { %758 = vperm.xlu0 %1133, %v756_v23   ;;  %v848_v23 = vsub.s32 2, %v1331_v46 }
 0x256   :  { %v728_v29 = vpop.xlane.xlu0 %727 }
 0x257   :  { %v746_v31 = vadd.f32 %v745_v28, %v728_v29 }
 0x259   :  { %v772_v37 = vrot.slane %v746_v31, %v771_v30 }
 0x25a   :  { %v730_v33 = vpop.xlane.xlu1 %729  ;;  %v732_v35 = vpop.xlane.xlu0 %731 }
 0x25b   :  { %v747_v34 = vadd.f32 %v745_v28, %v730_v33  ;;  %v748_v36 = vadd.f32 %v745_v28, %v732_v35  ;;  %v869_v33 = vsub.s32 5, %v1331_v46  ;;  %v883_v35 = vsub.s32 7, %v1331_v46 }
 0x25d   :  { %v776_v38 = vrot.slane %v747_v34, %v771_v30  ;;  %v780_v39 = vrot.slane %v748_v36, %v771_v30 }
 0x25e   :  { %v734_v40 = vpop.xlane.xlu1 %733  ;;  %v736_v41 = vpop.xlane.xlu0 %735 }
 0x25f   :  { %v802_v42 = vsel %vm801_vm2, %v776_v38, %v772_v37  ;;  %v749_v43 = vadd.f32 %v745_v28, %v734_v40  ;;  %v750_v44 = vadd.f32 %v745_v28, %v736_v41 }
 0x260   :  { %v804_v47 = vsel %vm803_vm3, %v780_v39, %v802_v42 }
 0x261   :  { %v784_v45 = vrot.slane %v749_v43, %v771_v30  ;;  %v788_v48 = vrot.slane %v750_v44, %v771_v30 }
 0x262   :  { %v738_v49 = vpop.xlane.xlu1 %737  ;;  %v740_v50 = vpop.xlane.xlu0 %739 }
 0x263   :  { %v806_v51 = vsel %vm805_vm4, %v784_v45, %v804_v47  ;;  %v751_v52 = vadd.f32 %v745_v28, %v738_v49  ;;  %v752_v53 = vadd.f32 %v745_v28, %v740_v50 }
 0x264   :  { %v808_v55 = vsel %vm807_vm5, %v788_v48, %v806_v51 }
 0x265   :  { %v792_v54 = vrot.slane %v751_v52, %v771_v30  ;;  %v796_v56 = vrot.slane %v752_v53, %v771_v30 }
 0x266   :  { %v742_v58 = vpop.xlane.xlu1 %741 }
 0x267   :  { %v753_v59 = vadd.f32 %v745_v28, %v742_v58  ;;  %v810_v60 = vsel %vm809_vm6, %v792_v54, %v808_v55  ;;  %v855_v28 = vsub.s32 3, %v1331_v46 }
 0x268   :  { %v812_v0 = vsel %vm811_vm7, %v796_v56, %v810_v60 }
 0x269   :  { %v800_v62 = vrot.slane %v753_v59, %v771_v30  ;;  %v862_v30 = vsub.s32 4, %v1331_v46 }
 0x26a   :  { %v759_v63 = vpop.permute.xlu0 %758 }
 0x26b   :  { %vm760_vm10 = vcmp.ge.s32.totalorder %v755_v27, %v759_v63  ;;  %v814_v1 = vsel %vm813_vm8, %v800_v62, %v812_v0 }
 0x26c   :  { %v816_v2 = vsel %vm760_vm10, -1e+30, %v814_v1 }
 0x26d   :  { %v818_v6 = vsel %vm817_vm9, %v816_v2, -inf }
 0x26e   :  { %819 = vmax.xlane.f32.xlu1 %v818_v6 }
 0x2fb   :  { %v820_v7 = vpop.xlane.xlu1 %819 }
 0x2fc   :  { %v821_v8 = vsub.f32 %v816_v2, %v820_v7 }
 0x2fe   :  { %v822_v9 = vmul.f32 1.442695, %v821_v8 }
 0x300   :  { %1150 = vpow2.f32 %v822_v9 }
 0x30a   :  { %v1151_v10 = vpop.eup %1150 }
 0x30b   :  { %v824_v4 = vsel %vm817_vm9, %v1151_v10, 0.0 }
 0x30c   :  { %825 = vadd.xlane.f32.xlu1 %v824_v4 }
 0x399   :  { %v826_v11 = vpop.xlane.xlu1 %825 }
 0x39a   :  { %1152 = vrcp.f32 %v826_v11 }
 0x3a4   :  { %v1153_v14 = vpop.eup %1152 }
 0x3a5   :  { %v828_v15 = vmul.f32 %v1153_v14, %v826_v11 }
 0x3a7   :  { %v829_v18 = vsub.f32 2.0, %v828_v15 }
 0x3a9   :  { %v830_v16 = vmul.f32 %v1153_v14, %v829_v18 }
 0x3ab   :  { %v831_v20 = vmul.f32 %v1151_v10, %v830_v16 }
 0x3ad   :  { %v877_v21 = vrot.slane %v831_v20, %v876_v12  ;;  %v835_v22 = vrot.slane %v831_v20, %v1338_v57  ;;  %v842_v19 = vrot.slane %v831_v20, %v841_v25  ;;  %v849_v27 = vrot.slane %v831_v20, %v848_v23 }
 0x3ae   :  { %v856_v29 = vrot.slane %v831_v20, %v855_v28  ;;  %v863_v31 = vrot.slane %v831_v20, %v862_v30  ;;  %v870_v57 = vrot.slane %v831_v20, %v869_v33  ;;  %v884_v34 = vrot.slane %v831_v20, %v883_v35 }
 0x3af   :  { %879 = vbcast.lane.b32.xlu0 %v877_v21, 256  ;;  %837 = vbcast.lane.b32.xlu1 %v835_v22, 256 }
 0x3b3   :  { %844 = vbcast.lane.b32.xlu1 %v842_v19, 256 }
 0x3b7   :  { %851 = vbcast.lane.b32.xlu1 %v849_v27, 256 }
 0x3bb   :  { %858 = vbcast.lane.b32.xlu1 %v856_v29, 256 }
 0x3bf   :  { %865 = vbcast.lane.b32.xlu1 %v863_v31, 256 }
 0x3c3   :  { %872 = vbcast.lane.b32.xlu1 %v870_v57, 256 }
 0x3c7   :  { %886 = vbcast.lane.b32.xlu1 %v884_v34, 256 }
 0x421   :  { %v838_v36 = vpop.permute.xlu1 %837  ;;  %v880_v43 = vpop.permute.xlu0 %879 }
 0x422   :  { %v888_v37 = vmul.f32 %v838_v36, %v1340_v61  ;;  %v894_v48 = vmul.f32 %v880_v43, %v1376_v26 }
 0x424   :  { %v896_v41 = vrot.slane %v888_v37, 4  ;;  %v932_v61 = vrot.slane %v894_v48, 4 }
 0x425   :  { %v845_v38 = vpop.permute.xlu1 %844 }
 0x426   :  { %v889_v39 = vmul.f32 %v845_v38, %v1343_v3  ;;  %v897_v46 = vadd.f32 %v896_v41, %v888_v37  ;;  %v933_v60 = vadd.f32 %v932_v61, %v894_v48 }
 0x428   :  { %v902_v40 = vrot.slane %v889_v39, 4  ;;  %v898_v53 = vrot.slane %v897_v46, 2  ;;  %v934_v9 = vrot.slane %v933_v60, 2 }
 0x429   :  { %v852_v42 = vpop.permute.xlu1 %851 }
 0x42a   :  { %v890_v44 = vmul.f32 %v852_v42, %v1348_v5  ;;  %v903_v45 = vadd.f32 %v902_v40, %v889_v39  ;;  %v899_v62 = vadd.f32 %v898_v53, %v897_v46  ;;  %v935_v22 = vadd.f32 %v934_v9, %v933_v60 }
 0x42c   :  { %v908_v47 = vrot.slane %v890_v44, 4  ;;  %v904_v52 = vrot.slane %v903_v45, 2  ;;  %v900_v10 = vrot.slane %v899_v62, 1  ;;  %v936_v33 = vrot.slane %v935_v22, 1 }
 0x42d   :  { %v859_v49 = vpop.permute.xlu1 %858 }
 0x42e   :  { %v909_v50 = vadd.f32 %v908_v47, %v890_v44  ;;  %v891_v51 = vmul.f32 %v859_v49, %v1358_v13  ;;  %v905_v59 = vadd.f32 %v904_v52, %v903_v45  ;;  %v937_v39 = vadd.f32 %v936_v33, %v935_v22 }
 0x430   :  { %v910_v54 = vrot.slane %v909_v50, 2  ;;  %v914_v3 = vrot.slane %v891_v51, 4  ;;  %v906_v6 = vrot.slane %v905_v59, 1 }
 0x431   :  { %v866_v55 = vpop.permute.xlu1 %865 }
 0x432   :  { %v892_v56 = vmul.f32 %v866_v55, %v1362_v17  ;;  %v915_v58 = vadd.f32 %v914_v3, %v891_v51  ;;  %v911_v63 = vadd.f32 %v910_v54, %v909_v50  ;;  %v907_v16 = vadd.f32 %v906_v6, %v905_v59 }
 0x434   :  { %v920_v5 = vrot.slane %v892_v56, 4  ;;  %v916_v26 = vrot.slane %v915_v58, 2  ;;  %v912_v4 = vrot.slane %v911_v63, 1 }
 0x435   :  { %v873_v0 = vpop.permute.xlu1 %872 }
 0x436   :  { %v921_v1 = vadd.f32 %v920_v5, %v892_v56  ;;  %v893_v2 = vmul.f32 %v873_v0, %v1373_v24  ;;  %v917_v13 = vadd.f32 %v916_v26, %v915_v58  ;;  %v913_v25 = vadd.f32 %v912_v4, %v911_v63 }
 0x437   :  { %v901_v24 = vadd.f32 %v900_v10, %v899_v62 }
 0x438   :  { %v922_v7 = vrot.slane %v921_v1, 2  ;;  %v926_v8 = vrot.slane %v893_v2, 4  ;;  %v918_v17 = vrot.slane %v917_v13, 1 }
 0x439   :  { %v887_v11 = vpop.permute.xlu1 %886  ;;  %v952_v29 = vsel %vm801_vm2, %v907_v16, %v901_v24 }
 0x43a   :  { %v923_v14 = vadd.f32 %v922_v7, %v921_v1  ;;  %v927_v15 = vadd.f32 %v926_v8, %v893_v2  ;;  %v895_v18 = vmul.f32 %v887_v11, %v1389_v32  ;;  %v919_v19 = vadd.f32 %v918_v17, %v917_v13 }
 0x43b   :  { %v953_v57 = vsel %vm803_vm3, %v913_v25, %v952_v29 }
 0x43c   :  { %v924_v12 = vrot.slane %v923_v14, 1  ;;  %v928_v20 = vrot.slane %v927_v15, 2  ;;  %v938_v21 = vrot.slane %v895_v18, 4  ;;  %v954_v32 = vsel %vm805_vm4, %v919_v19, %v953_v57 }
 0x43e   :  { %v929_v23 = vadd.f32 %v928_v20, %v927_v15  ;;  %v939_v27 = vadd.f32 %v938_v21, %v895_v18  ;;  %v925_v28 = vadd.f32 %v924_v12, %v923_v14 }
 0x440   :  { %v930_v30 = vrot.slane %v929_v23, 1  ;;  %v940_v31 = vrot.slane %v939_v27, 2  ;;  %v955_v36 = vsel %vm807_vm5, %v925_v28, %v954_v32 }
 0x442   :  { %v931_v35 = vadd.f32 %v930_v30, %v929_v23  ;;  %v941_v34 = vadd.f32 %v940_v31, %v939_v27 }
 0x444   :  { %v942_v37 = vrot.slane %v941_v34, 1  ;;  %v956_v38 = vsel %vm809_vm6, %v931_v35, %v955_v36 }
 0x445   :  { %v957_v41 = vsel %vm811_vm7, %v937_v39, %v956_v38 }
 0x446   :  { %v943_v40 = vadd.f32 %v942_v37, %v941_v34 }
 0x448   :  { %v958_v42 = vsel %vm813_vm8, %v943_v40, %v957_v41 }
 0x449   :  { %960 = vst [vmem:[#allocation8] sm:$0xff] %v958_v42 }
 0x44a   :  { %1209 = shalt.err (!%p1206_p6)
}
 0x44b   :  { %s1210_s12 = scalar_lea.hbm %s1459_s7, 128 }
 0x44c   :  { %p1211_p7 = scmp.ne.s32.totalorder %s1459_s7, %s1210_s12  ;;  %p1214_p8 = scmp.lt.u32.totalorder %s1210_s12, %s1459_s7 }
 0x44e   :  { %p1216_p9 = pnand %p1214_p8, %p1211_p7 }
 0x450   :  { %1219 = shalt.err (!%p1216_p9)
}
 0x451   :  { %970 = dma.vmem_to_hbm [thread:$0]  %s968_s9, 128, %s1459_s7, [#allocation5]  }
 0x452   :  { %1224 = dma.done.wait [#allocation5], 128  }
 0x453   :  { %1225 = vsyncadd [#allocation5], 4294967168 }
 0x454   :  { %974 = vsyncpa [#allocation4], 1 }
 0x455   :  { %975 = vsyncpa [#allocation7], 1 }
 0x456   :  { %976 = vsyncpa [#allocation5], 1 }

</bundles_post_ra>
